<compile_context>
chip_gen: v6e
topology: v6e:2x2x1
jax: 0.10.0
libtpu: 0.0.40
codegen_flags: <defaults>
</compile_context>

<pallas_src>
import functools

import jax
import jax.numpy as jnp
from jax.experimental import pallas as pl
from jax.experimental.pallas import tpu as pltpu

LANE = 128     # vreg lane width  (last dim)
SUBLANE = 8    # vreg sublane width (second-to-last dim)


def _round_up(n, m):
    return ((n + m - 1) // m) * m


def _critic_kernel(num_hidden, *refs):
    """refs = (x, w_in, b_in, [w_hid_stack, b_hid_stack], w_out_row, b_out_row, out)."""
    x_ref, w_in_ref, b_in_ref = refs[0], refs[1], refs[2]
    if num_hidden > 0:
        w_hid_ref, b_hid_ref = refs[3], refs[4]
        w_out_ref, b_out_ref, out_ref = refs[5], refs[6], refs[7]
    else:
        w_out_ref, b_out_ref, out_ref = refs[3], refs[4], refs[5]

    # First layer: MXU matmul (full 128-wide lanes thanks to padding) + ReLU.
    h = jnp.dot(x_ref[...], w_in_ref[...], preferred_element_type=jnp.float32)
    h = jnp.maximum(h + b_in_ref[...], 0.0)

    # Hidden layers: stacked [L, Hp, Hp] weights, loop over the leading dim.
    for l in range(num_hidden):
        h = jnp.dot(h, w_hid_ref[l], preferred_element_type=jnp.float32)
        h = jnp.maximum(h + b_hid_ref[l], 0.0)

    # Value head: VPU multiply + cross-lane (XLU) reduction instead of an
    # N=1 MXU matmul.  Padded lanes of h and w_out are zero, so the sum is
    # exactly h @ W_last.
    v = jnp.sum(h * w_out_ref[...], axis=-1, keepdims=True)      # [bm, 1]
    # Lane-dense store: broadcast the value + bias across all 128 lanes.
    out_ref[...] = v + b_out_ref[...]                             # [bm, 128]


def critic_forward(x, weights, biases, *, block_batch=None,
                   single_buffer_params=True):
    """Critic MLP forward pass with a Pallas TPU kernel.

    x:       [B, state_space] float32
    weights: list of [in_i, out_i] float32 (PyTorch-transposed), last is [H, 1]
    biases:  list of [1, out_i] float32
    returns: [B, 1] float32
    """
    B, S = x.shape
    num_layers = len(weights)
    num_hidden = num_layers - 2          # number of [H, H] hidden layers
    H = weights[0].shape[1]
    assert weights[-1].shape[1] == 1

    # ---- pad feature dims to full lanes, batch to sublane / block multiple ----
    Sp = _round_up(S, LANE)
    Hp = _round_up(H, LANE)

    if block_batch is None:
        # Full (padded) batch per step at small B; cap so large batches get a
        # multi-step grid that ("parallel",) can shard across v7x's 2 TCs.
        block_batch = min(512, _round_up(B, SUBLANE))
    block_batch = _round_up(block_batch, SUBLANE)
    Bp = _round_up(B, block_batch)
    grid = (Bp // block_batch,)

    x_p = jnp.zeros((Bp, Sp), jnp.float32).at[:B, :S].set(x)

    w_in = jnp.zeros((Sp, Hp), jnp.float32).at[:S, :H].set(weights[0])
    b_in = jnp.zeros((1, Hp), jnp.float32).at[:, :H].set(
        jnp.asarray(biases[0]).reshape(1, H))

    if num_hidden > 0:
        w_hid = jnp.zeros((num_hidden, Hp, Hp), jnp.float32)
        b_hid = jnp.zeros((num_hidden, 1, Hp), jnp.float32)
        for l in range(num_hidden):
            w_hid = w_hid.at[l, :H, :H].set(weights[1 + l])
            b_hid = b_hid.at[l, :, :H].set(jnp.asarray(biases[1 + l]).reshape(1, H))

    # Final head as a [1, Hp] row (zero-padded); bias replicated across lanes
    # so the output store is a plain full-lane vst.
    w_out = jnp.zeros((1, Hp), jnp.float32).at[:, :H].set(
        jnp.asarray(weights[-1]).reshape(1, H))
    b_out = jnp.full((1, LANE), jnp.asarray(biases[-1]).reshape(()), jnp.float32)

    # NOTE: for scaled-up hidden dims (H >= 2048 f32) on v7x (64 MiB VMEM),
    # set vmem_limit_bytes explicitly and tile the hidden matmuls over K/N.
    # At these shapes everything fits the default scoped limit comfortably.

    def _build(single_buffer):
        def param_spec(shape):
            ndim = len(shape)
            index_map = lambda i, _n=ndim: (0,) * _n
            if single_buffer:
                # Constant index map -> single-buffer the resident parameters.
                return pl.BlockSpec(shape, index_map,
                                    pipeline_mode=pl.Buffered(1))
            return pl.BlockSpec(shape, index_map)

        in_specs = [pl.BlockSpec((block_batch, Sp), lambda i: (i, 0)),
                    param_spec(w_in.shape),
                    param_spec(b_in.shape)]
        if num_hidden > 0:
            in_specs.append(param_spec(w_hid.shape))
            in_specs.append(param_spec(b_hid.shape))
        in_specs.append(param_spec(w_out.shape))
        in_specs.append(param_spec(b_out.shape))

        out_spec = pl.BlockSpec((block_batch, LANE), lambda i: (i, 0))

        return pl.pallas_call(
            functools.partial(_critic_kernel, num_hidden),
            out_shape=jax.ShapeDtypeStruct((Bp, LANE), jnp.float32),
            grid=grid,
            in_specs=in_specs,
            out_specs=out_spec,
            compiler_params=pltpu.CompilerParams(
                dimension_semantics=("parallel",)),
        )

    args = [x_p, w_in, b_in]
    if num_hidden > 0:
        args += [w_hid, b_hid]
    args += [w_out, b_out]

    try:
        out_pad = _build(single_buffer_params)(*args)
    except Exception:
        # Fallback to default double-buffering if Buffered(1) is not
        # supported by the installed JAX / Mosaic version.
        out_pad = _build(False)(*args)

    return out_pad[:B, :1]


def init_critic_params(key, state_space, num_hidden_layer=2, hidden_dim=None):
    """Deterministic init mimicking PyTorch nn.Linear default U(-1/sqrt(fan_in), ...)."""
    if hidden_dim is None:
        hidden_dim = state_space * 2
    dims = [state_space] + [hidden_dim] * (num_hidden_layer + 1) + [1]
    weights, biases = [], []
    for i in range(len(dims) - 1):
        fan_in, fan_out = dims[i], dims[i + 1]
        key, kw, kb = jax.random.split(key, 3)
        bound = 1.0 / jnp.sqrt(jnp.float32(fan_in))
        w = jax.random.uniform(kw, (fan_in, fan_out), jnp.float32, -bound, bound)
        b = jax.random.uniform(kb, (1, fan_out), jnp.float32, -bound, bound)
        weights.append(w)
        biases.append(b)
    return weights, biases


def critic_forward_ref(x, weights, biases):
    """Pure-JAX reference for correctness check."""
    h = x
    for w, b in zip(weights[:-1], biases[:-1]):
        h = jnp.maximum(h @ w + b, 0.0)
    return h @ weights[-1] + biases[-1]


if __name__ == "__main__":
    # Shapes consistent with the module: batch=8, state_space=32,
    # num_hidden_layer=2, hidden_dim defaults to 2*state_space=64.
    key = jax.random.PRNGKey(0)
    key, kx = jax.random.split(key)

    batch = 8
    state_space = 32
    num_hidden_layer = 2

    x = jax.random.normal(kx, (batch, state_space), jnp.float32)
    weights, biases = init_critic_params(key, state_space, num_hidden_layer)

    out = jax.block_until_ready(critic_forward(x, weights, biases))

    ref = critic_forward_ref(x, weights, biases)
    assert out.shape == (batch, 1)
    assert jnp.allclose(out, ref, atol=1e-4, rtol=1e-4), "mismatch vs reference"

    print("KERNEL_OK")
</pallas_src>

<mosaic_0001>
module attributes {stable_mosaic.version = 11 : i64} {
  func.func @_critic_kernel(%arg0: i32, %arg1: memref<8x128xf32, #tpu.memory_space<vmem>>, %arg2: memref<128x128xf32, #tpu.memory_space<vmem>>, %arg3: memref<1x128xf32, #tpu.memory_space<vmem>>, %arg4: memref<2x128x128xf32, #tpu.memory_space<vmem>>, %arg5: memref<2x1x128xf32, #tpu.memory_space<vmem>>, %arg6: memref<1x128xf32, #tpu.memory_space<vmem>>, %arg7: memref<1x128xf32, #tpu.memory_space<vmem>>, %arg8: memref<8x128xf32, #tpu.memory_space<vmem>>) attributes {dimension_semantics = [#tpu.dimension_semantics<parallel>], iteration_bounds = array<i64: 1>, scalar_prefetch = 0 : i64, scratch_operands = 0 : i64, tpu.core_type = #tpu.core_type<tc>, window_params = [{transform_indices = @transform_0, window_bounds = array<i64: 8, 128>}, {pipeline_mode = #tpu.pipeline_mode<synchronous>, transform_indices = @transform_1, window_bounds = array<i64: 128, 128>}, {pipeline_mode = #tpu.pipeline_mode<synchronous>, transform_indices = @transform_2, window_bounds = array<i64: 1, 128>}, {pipeline_mode = #tpu.pipeline_mode<synchronous>, transform_indices = @transform_3, window_bounds = array<i64: 2, 128, 128>}, {pipeline_mode = #tpu.pipeline_mode<synchronous>, transform_indices = @transform_4, window_bounds = array<i64: 2, 1, 128>}, {pipeline_mode = #tpu.pipeline_mode<synchronous>, transform_indices = @transform_5, window_bounds = array<i64: 1, 128>}, {pipeline_mode = #tpu.pipeline_mode<synchronous>, transform_indices = @transform_6, window_bounds = array<i64: 1, 128>}, {transform_indices = @transform_7, window_bounds = array<i64: 8, 128>}]} {
    %c0 = arith.constant 0 : index
    %c0_0 = arith.constant 0 : index
    %0 = vector.load %arg1[%c0, %c0_0] : memref<8x128xf32, #tpu.memory_space<vmem>>, vector<8x128xf32>
    %c0_1 = arith.constant 0 : index
    %c0_2 = arith.constant 0 : index
    %1 = vector.load %arg2[%c0_1, %c0_2] : memref<128x128xf32, #tpu.memory_space<vmem>>, vector<128x128xf32>
    %cst = arith.constant dense<0.000000e+00> : vector<8x128xf32>
    %2 = tpu.matmul %0, %1, %cst {dimension_numbers = #tpu.dot_dimension_numbers<[1], [0], [0], [1], [0, 0, 1, 1], [], []>} : vector<8x128xf32>, vector<128x128xf32>, vector<8x128xf32> -> vector<8x128xf32>
    %c0_3 = arith.constant 0 : index
    %c0_4 = arith.constant 0 : index
    %3 = vector.load %arg3[%c0_3, %c0_4] : memref<1x128xf32, #tpu.memory_space<vmem>>, vector<1x128xf32>
    %4 = vector.broadcast %3 : vector<1x128xf32> to vector<8x128xf32>
    %5 = arith.addf %2, %4 : vector<8x128xf32>
    %cst_5 = arith.constant 0.000000e+00 : f32
    %6 = vector.broadcast %cst_5 : f32 to vector<8x128xf32>
    %7 = arith.maximumf %5, %6 : vector<8x128xf32>
    %c0_6 = arith.constant 0 : index
    %c0_7 = arith.constant 0 : index
    %c0_8 = arith.constant 0 : index
    %8 = vector.load %arg4[%c0_6, %c0_7, %c0_8] : memref<2x128x128xf32, #tpu.memory_space<vmem>>, vector<1x128x128xf32>
    %9 = vector.shape_cast %8 : vector<1x128x128xf32> to vector<128x128xf32>
    %cst_9 = arith.constant dense<0.000000e+00> : vector<8x128xf32>
    %10 = tpu.matmul %7, %9, %cst_9 {dimension_numbers = #tpu.dot_dimension_numbers<[1], [0], [0], [1], [0, 0, 1, 1], [], []>} : vector<8x128xf32>, vector<128x128xf32>, vector<8x128xf32> -> vector<8x128xf32>
    %c0_10 = arith.constant 0 : index
    %c0_11 = arith.constant 0 : index
    %c0_12 = arith.constant 0 : index
    %11 = vector.load %arg5[%c0_10, %c0_11, %c0_12] : memref<2x1x128xf32, #tpu.memory_space<vmem>>, vector<1x1x128xf32>
    %12 = vector.shape_cast %11 : vector<1x1x128xf32> to vector<1x128xf32>
    %13 = vector.broadcast %12 : vector<1x128xf32> to vector<8x128xf32>
    %14 = arith.addf %10, %13 : vector<8x128xf32>
    %cst_13 = arith.constant 0.000000e+00 : f32
    %15 = vector.broadcast %cst_13 : f32 to vector<8x128xf32>
    %16 = arith.maximumf %14, %15 : vector<8x128xf32>
    %c1 = arith.constant 1 : index
    %c0_14 = arith.constant 0 : index
    %c0_15 = arith.constant 0 : index
    %17 = vector.load %arg4[%c1, %c0_14, %c0_15] : memref<2x128x128xf32, #tpu.memory_space<vmem>>, vector<1x128x128xf32>
    %18 = vector.shape_cast %17 : vector<1x128x128xf32> to vector<128x128xf32>
    %cst_16 = arith.constant dense<0.000000e+00> : vector<8x128xf32>
    %19 = tpu.matmul %16, %18, %cst_16 {dimension_numbers = #tpu.dot_dimension_numbers<[1], [0], [0], [1], [0, 0, 1, 1], [], []>} : vector<8x128xf32>, vector<128x128xf32>, vector<8x128xf32> -> vector<8x128xf32>
    %c1_17 = arith.constant 1 : index
    %c0_18 = arith.constant 0 : index
    %c0_19 = arith.constant 0 : index
    %20 = vector.load %arg5[%c1_17, %c0_18, %c0_19] : memref<2x1x128xf32, #tpu.memory_space<vmem>>, vector<1x1x128xf32>
    %21 = vector.shape_cast %20 : vector<1x1x128xf32> to vector<1x128xf32>
    %22 = vector.broadcast %21 : vector<1x128xf32> to vector<8x128xf32>
    %23 = arith.addf %19, %22 : vector<8x128xf32>
    %cst_20 = arith.constant 0.000000e+00 : f32
    %24 = vector.broadcast %cst_20 : f32 to vector<8x128xf32>
    %25 = arith.maximumf %23, %24 : vector<8x128xf32>
    %c0_21 = arith.constant 0 : index
    %c0_22 = arith.constant 0 : index
    %26 = vector.load %arg6[%c0_21, %c0_22] : memref<1x128xf32, #tpu.memory_space<vmem>>, vector<1x128xf32>
    %27 = vector.broadcast %26 : vector<1x128xf32> to vector<8x128xf32>
    %28 = arith.mulf %25, %27 : vector<8x128xf32>
    %cst_23 = arith.constant dense<0.000000e+00> : vector<8xf32>
    %29 = vector.multi_reduction <add>, %28, %cst_23 [1] : vector<8x128xf32> to vector<8xf32>
    %30 = vector.shape_cast %29 : vector<8xf32> to vector<8x1xf32>
    %c0_24 = arith.constant 0 : index
    %c0_25 = arith.constant 0 : index
    %31 = vector.load %arg7[%c0_24, %c0_25] : memref<1x128xf32, #tpu.memory_space<vmem>>, vector<1x128xf32>
    %32 = vector.broadcast %30 : vector<8x1xf32> to vector<8x128xf32>
    %33 = vector.broadcast %31 : vector<1x128xf32> to vector<8x128xf32>
    %34 = arith.addf %32, %33 : vector<8x128xf32>
    %c0_26 = arith.constant 0 : index
    %c0_27 = arith.constant 0 : index
    %35 = vector.load %arg8[%c0_26, %c0_27] : memref<8x128xf32, #tpu.memory_space<vmem>>, vector<8x128xf32>
    tpu.vector_store %arg8[%c0_26, %c0_27], %34 {strides = array<i32>} : memref<8x128xf32, #tpu.memory_space<vmem>>, vector<8x128xf32>,
    return
  }
  func.func @transform_0(%arg0: i32) -> (i32, i32) {
    %c0_i32 = arith.constant 0 : i32
    %c0_i32_0 = arith.constant 0 : i32
    return %arg0, %c0_i32 : i32, i32
  }
  func.func @transform_1(%arg0: i32) -> (i32, i32) {
    %c0_i32 = arith.constant 0 : i32
    %c0_i32_0 = arith.constant 0 : i32
    %c0_i32_1 = arith.constant 0 : i32
    return %c0_i32, %c0_i32_0 : i32, i32
  }
  func.func @transform_2(%arg0: i32) -> (i32, i32) {
    %c0_i32 = arith.constant 0 : i32
    %c0_i32_0 = arith.constant 0 : i32
    %c0_i32_1 = arith.constant 0 : i32
    return %c0_i32, %c0_i32_0 : i32, i32
  }
  func.func @transform_3(%arg0: i32) -> (i32, i32, i32) {
    %c0_i32 = arith.constant 0 : i32
    %c0_i32_0 = arith.constant 0 : i32
    %c0_i32_1 = arith.constant 0 : i32
    %c0_i32_2 = arith.constant 0 : i32
    return %c0_i32, %c0_i32_0, %c0_i32_1 : i32, i32, i32
  }
  func.func @transform_4(%arg0: i32) -> (i32, i32, i32) {
    %c0_i32 = arith.constant 0 : i32
    %c0_i32_0 = arith.constant 0 : i32
    %c0_i32_1 = arith.constant 0 : i32
    %c0_i32_2 = arith.constant 0 : i32
    return %c0_i32, %c0_i32_0, %c0_i32_1 : i32, i32, i32
  }
  func.func @transform_5(%arg0: i32) -> (i32, i32) {
    %c0_i32 = arith.constant 0 : i32
    %c0_i32_0 = arith.constant 0 : i32
    %c0_i32_1 = arith.constant 0 : i32
    return %c0_i32, %c0_i32_0 : i32, i32
  }
  func.func @transform_6(%arg0: i32) -> (i32, i32) {
    %c0_i32 = arith.constant 0 : i32
    %c0_i32_0 = arith.constant 0 : i32
    %c0_i32_1 = arith.constant 0 : i32
    return %c0_i32, %c0_i32_0 : i32, i32
  }
  func.func @transform_7(%arg0: i32) -> (i32, i32) {
    %c0_i32 = arith.constant 0 : i32
    %c0_i32_0 = arith.constant 0 : i32
    return %arg0, %c0_i32 : i32, i32
  }
}

module attributes {stable_mosaic.version = 11 : i64} {
  func.func @_critic_kernel(%arg0: i32, %arg1: memref<8x128xf32, #tpu.memory_space<vmem>>, %arg2: memref<128x128xf32, #tpu.memory_space<vmem>>, %arg3: memref<1x128xf32, #tpu.memory_space<vmem>>, %arg4: memref<2x128x128xf32, #tpu.memory_space<vmem>>, %arg5: memref<2x1x128xf32, #tpu.memory_space<vmem>>, %arg6: memref<1x128xf32, #tpu.memory_space<vmem>>, %arg7: memref<1x128xf32, #tpu.memory_space<vmem>>, %arg8: memref<8x128xf32, #tpu.memory_space<vmem>>) attributes {dimension_semantics = [#tpu.dimension_semantics<parallel>], iteration_bounds = array<i64: 1>, scalar_prefetch = 0 : i64, scratch_operands = 0 : i64, tpu.core_type = #tpu.core_type<tc>, window_params = [{transform_indices = @transform_0, window_bounds = array<i64: 8, 128>}, {pipeline_mode = #tpu.pipeline_mode<synchronous>, transform_indices = @transform_1, window_bounds = array<i64: 128, 128>}, {pipeline_mode = #tpu.pipeline_mode<synchronous>, transform_indices = @transform_2, window_bounds = array<i64: 1, 128>}, {pipeline_mode = #tpu.pipeline_mode<synchronous>, transform_indices = @transform_3, window_bounds = array<i64: 2, 128, 128>}, {pipeline_mode = #tpu.pipeline_mode<synchronous>, transform_indices = @transform_4, window_bounds = array<i64: 2, 1, 128>}, {pipeline_mode = #tpu.pipeline_mode<synchronous>, transform_indices = @transform_5, window_bounds = array<i64: 1, 128>}, {pipeline_mode = #tpu.pipeline_mode<synchronous>, transform_indices = @transform_6, window_bounds = array<i64: 1, 128>}, {transform_indices = @transform_7, window_bounds = array<i64: 8, 128>}]} {
    %c0 = arith.constant 0 : index
    %c0_0 = arith.constant 0 : index
    %0 = vector.load %arg1[%c0, %c0_0] : memref<8x128xf32, #tpu.memory_space<vmem>>, vector<8x128xf32>
    %c0_1 = arith.constant 0 : index
    %c0_2 = arith.constant 0 : index
    %1 = vector.load %arg2[%c0_1, %c0_2] : memref<128x128xf32, #tpu.memory_space<vmem>>, vector<128x128xf32>
    %cst = arith.constant dense<0.000000e+00> : vector<8x128xf32>
    %2 = tpu.matmul %0, %1, %cst {dimension_numbers = #tpu.dot_dimension_numbers<[1], [0], [0], [1], [0, 0, 1, 1], [], []>} : vector<8x128xf32>, vector<128x128xf32>, vector<8x128xf32> -> vector<8x128xf32>
    %c0_3 = arith.constant 0 : index
    %c0_4 = arith.constant 0 : index
    %3 = vector.load %arg3[%c0_3, %c0_4] : memref<1x128xf32, #tpu.memory_space<vmem>>, vector<1x128xf32>
    %4 = vector.broadcast %3 : vector<1x128xf32> to vector<8x128xf32>
    %5 = arith.addf %2, %4 : vector<8x128xf32>
    %cst_5 = arith.constant 0.000000e+00 : f32
    %6 = vector.broadcast %cst_5 : f32 to vector<8x128xf32>
    %7 = arith.maximumf %5, %6 : vector<8x128xf32>
    %c0_6 = arith.constant 0 : index
    %c0_7 = arith.constant 0 : index
    %c0_8 = arith.constant 0 : index
    %8 = vector.load %arg4[%c0_6, %c0_7, %c0_8] : memref<2x128x128xf32, #tpu.memory_space<vmem>>, vector<1x128x128xf32>
    %9 = vector.shape_cast %8 : vector<1x128x128xf32> to vector<128x128xf32>
    %cst_9 = arith.constant dense<0.000000e+00> : vector<8x128xf32>
    %10 = tpu.matmul %7, %9, %cst_9 {dimension_numbers = #tpu.dot_dimension_numbers<[1], [0], [0], [1], [0, 0, 1, 1], [], []>} : vector<8x128xf32>, vector<128x128xf32>, vector<8x128xf32> -> vector<8x128xf32>
    %c0_10 = arith.constant 0 : index
    %c0_11 = arith.constant 0 : index
    %c0_12 = arith.constant 0 : index
    %11 = vector.load %arg5[%c0_10, %c0_11, %c0_12] : memref<2x1x128xf32, #tpu.memory_space<vmem>>, vector<1x1x128xf32>
    %12 = vector.shape_cast %11 : vector<1x1x128xf32> to vector<1x128xf32>
    %13 = vector.broadcast %12 : vector<1x128xf32> to vector<8x128xf32>
    %14 = arith.addf %10, %13 : vector<8x128xf32>
    %cst_13 = arith.constant 0.000000e+00 : f32
    %15 = vector.broadcast %cst_13 : f32 to vector<8x128xf32>
    %16 = arith.maximumf %14, %15 : vector<8x128xf32>
    %c1 = arith.constant 1 : index
    %c0_14 = arith.constant 0 : index
    %c0_15 = arith.constant 0 : index
    %17 = vector.load %arg4[%c1, %c0_14, %c0_15] : memref<2x128x128xf32, #tpu.memory_space<vmem>>, vector<1x128x128xf32>
    %18 = vector.shape_cast %17 : vector<1x128x128xf32> to vector<128x128xf32>
    %cst_16 = arith.constant dense<0.000000e+00> : vector<8x128xf32>
    %19 = tpu.matmul %16, %18, %cst_16 {dimension_numbers = #tpu.dot_dimension_numbers<[1], [0], [0], [1], [0, 0, 1, 1], [], []>} : vector<8x128xf32>, vector<128x128xf32>, vector<8x128xf32> -> vector<8x128xf32>
    %c1_17 = arith.constant 1 : index
    %c0_18 = arith.constant 0 : index
    %c0_19 = arith.constant 0 : index
    %20 = vector.load %arg5[%c1_17, %c0_18, %c0_19] : memref<2x1x128xf32, #tpu.memory_space<vmem>>, vector<1x1x128xf32>
    %21 = vector.shape_cast %20 : vector<1x1x128xf32> to vector<1x128xf32>
    %22 = vector.broadcast %21 : vector<1x128xf32> to vector<8x128xf32>
    %23 = arith.addf %19, %22 : vector<8x128xf32>
    %cst_20 = arith.constant 0.000000e+00 : f32
    %24 = vector.broadcast %cst_20 : f32 to vector<8x128xf32>
    %25 = arith.maximumf %23, %24 : vector<8x128xf32>
    %c0_21 = arith.constant 0 : index
    %c0_22 = arith.constant 0 : index
    %26 = vector.load %arg6[%c0_21, %c0_22] : memref<1x128xf32, #tpu.memory_space<vmem>>, vector<1x128xf32>
    %27 = vector.broadcast %26 : vector<1x128xf32> to vector<8x128xf32>
    %28 = arith.mulf %25, %27 : vector<8x128xf32>
    %cst_23 = arith.constant dense<0.000000e+00> : vector<8xf32>
    %29 = vector.multi_reduction <add>, %28, %cst_23 [1] : vector<8x128xf32> to vector<8xf32>
    %30 = vector.shape_cast %29 : vector<8xf32> to vector<8x1xf32>
    %c0_24 = arith.constant 0 : index
    %c0_25 = arith.constant 0 : index
    %31 = vector.load %arg7[%c0_24, %c0_25] : memref<1x128xf32, #tpu.memory_space<vmem>>, vector<1x128xf32>
    %32 = vector.broadcast %30 : vector<8x1xf32> to vector<8x128xf32>
    %33 = vector.broadcast %31 : vector<1x128xf32> to vector<8x128xf32>
    %34 = arith.addf %32, %33 : vector<8x128xf32>
    %c0_26 = arith.constant 0 : index
    %c0_27 = arith.constant 0 : index
    %35 = vector.load %arg8[%c0_26, %c0_27] : memref<8x128xf32, #tpu.memory_space<vmem>>, vector<8x128xf32>
    tpu.vector_store %arg8[%c0_26, %c0_27], %34 {strides = array<i32>} : memref<8x128xf32, #tpu.memory_space<vmem>>, vector<8x128xf32>,
    return
  }
  func.func @transform_0(%arg0: i32) -> (i32, i32) {
    %c0_i32 = arith.constant 0 : i32
    %c0_i32_0 = arith.constant 0 : i32
    return %arg0, %c0_i32 : i32, i32
  }
  func.func @transform_1(%arg0: i32) -> (i32, i32) {
    %c0_i32 = arith.constant 0 : i32
    %c0_i32_0 = arith.constant 0 : i32
    %c0_i32_1 = arith.constant 0 : i32
    return %c0_i32, %c0_i32_0 : i32, i32
  }
  func.func @transform_2(%arg0: i32) -> (i32, i32) {
    %c0_i32 = arith.constant 0 : i32
    %c0_i32_0 = arith.constant 0 : i32
    %c0_i32_1 = arith.constant 0 : i32
    return %c0_i32, %c0_i32_0 : i32, i32
  }
  func.func @transform_3(%arg0: i32) -> (i32, i32, i32) {
    %c0_i32 = arith.constant 0 : i32
    %c0_i32_0 = arith.constant 0 : i32
    %c0_i32_1 = arith.constant 0 : i32
    %c0_i32_2 = arith.constant 0 : i32
    return %c0_i32, %c0_i32_0, %c0_i32_1 : i32, i32, i32
  }
  func.func @transform_4(%arg0: i32) -> (i32, i32, i32) {
    %c0_i32 = arith.constant 0 : i32
    %c0_i32_0 = arith.constant 0 : i32
    %c0_i32_1 = arith.constant 0 : i32
    %c0_i32_2 = arith.constant 0 : i32
    return %c0_i32, %c0_i32_0, %c0_i32_1 : i32, i32, i32
  }
  func.func @transform_5(%arg0: i32) -> (i32, i32) {
    %c0_i32 = arith.constant 0 : i32
    %c0_i32_0 = arith.constant 0 : i32
    %c0_i32_1 = arith.constant 0 : i32
    return %c0_i32, %c0_i32_0 : i32, i32
  }
  func.func @transform_6(%arg0: i32) -> (i32, i32) {
    %c0_i32 = arith.constant 0 : i32
    %c0_i32_0 = arith.constant 0 : i32
    %c0_i32_1 = arith.constant 0 : i32
    return %c0_i32, %c0_i32_0 : i32, i32
  }
  func.func @transform_7(%arg0: i32) -> (i32, i32) {
    %c0_i32 = arith.constant 0 : i32
    %c0_i32_0 = arith.constant 0 : i32
    return %arg0, %c0_i32 : i32, i32
  }
}

</mosaic_0001>

<bundles_post_ra>
// kernel: tpu_custom_call.1
= control target key start
LH: loop header
LB: loop body
LE: loop exit
PB: predicated region body
PF: predicated region fallthrough
CT: control target
= control target key end

     0   :  { %12 = vsyncpa [#allocation3], 0  ;;  %s771_s0 = inlined_call_operand.hbm [shape: f32[8,128], index: 0, kind: input, shape index: {}]   ;;  %s772_s1 = inlined_call_operand.hbm [shape: f32[128,128], index: 1, kind: input, shape index: {}]   ;;  %s773_s2 = inlined_call_operand.vmem [shape: f32[1,128], index: 2, kind: input, shape index: {}]   ;;  %s774_s3 = inlined_call_operand.hbm [shape: f32[2,128,128], index: 3, kind: input, shape index: {}]   ;;  %s775_s4 = inlined_call_operand.vmem [shape: f32[2,1,128], index: 4, kind: input, shape index: {}]   ;;  %s776_s5 = inlined_call_operand.vmem [shape: f32[1,128], index: 5, kind: input, shape index: {}]   ;;  %s777_s6 = inlined_call_operand.vmem [shape: f32[1,128], index: 6, kind: input, shape index: {}]   ;;  %s778_s7 = inlined_call_operand.hbm [shape: f32[8,128], index: 7, kind: output, shape index: {}]  }
   0x1   :  { %13 = vsyncpa [#allocation6], 0 }
   0x2   :  { %14 = vsyncpa [#allocation4], 0  ;;  %s642_s24 = smov [#allocation5]  }
   0x3   :  { %s30_s25 = sshll.u32 %s642_s24, 4  ;;  %s31_s25 = int_to_ptr.vmem [resolvable:$true] %s30_s25 }
   0x4   :  { %s564_s26 = scalar_lea.vmem %s31_s25, 2048  ;;  %p569_p1 = scmp.lt.s32.totalorder %s31_s25, %s31_s25 }
   0x5   :  { %p565_p0 = scmp.ne.s32.totalorder %s31_s25, %s564_s26  ;;  %p570_p2 = scmp.lt.s32.totalorder %s564_s26, %s564_s26 }
   0x7   :  { %p571_p3 = por %p570_p2, %p569_p1 }
   0x9   :  { %p572_p4 = pnand %p571_p3, %p565_p0 }
   0xb   :  { %575 = shalt.err (!%p572_p4)
}
   0xc   :  { %s643_s27 = smov 128   ;;  %s644_s28 = smov 8  }
   0xd   :  { %36 = dma.hbm_to_vmem [thread:$0]  %s772_s1, 2048, %s31_s25, [#allocation6], %s643_s27, %s643_s27, %s644_s28  }
   0xe   :  { %s645_s8 = smov [#allocation2]   ;;  %s646_s10 = smov [#allocation7]  }
   0xf   :  { %s21_s9 = sshll.u32 %s645_s8, 4  ;;  %s44_s11 = sshll.u32 %s646_s10, 4  ;;  %s22_s9 = int_to_ptr.vmem [resolvable:$true] %s21_s9  ;;  %s45_s11 = int_to_ptr.vmem [resolvable:$true] %s44_s11 }
  0x10   :  { %s584_s12 = scalar_lea.vmem %s22_s9, 128  ;;  %p589_p6 = scmp.lt.s32.totalorder %s22_s9, %s22_s9 }
  0x11   :  { %p585_p5 = scmp.ne.s32.totalorder %s22_s9, %s584_s12  ;;  %p590_p7 = scmp.lt.s32.totalorder %s584_s12, %s584_s12 }
  0x13   :  { %p591_p8 = por %p590_p7, %p589_p6 }
  0x15   :  { %p592_p9 = pnand %p591_p8, %p585_p5 }
  0x17   :  { %595 = shalt.err (!%p592_p9)
}
  0x18   :  { %24 = dma.hbm_to_vmem [thread:$0]  %s771_s0, 128, %s22_s9, [#allocation3]  }
  0x19   :  { %s604_s15 = scalar_lea.vmem %s45_s11, 4096  ;;  %p609_p11 = scmp.lt.s32.totalorder %s45_s11, %s45_s11 }
  0x1a   :  { %p605_p10 = scmp.ne.s32.totalorder %s45_s11, %s604_s15  ;;  %p610_p12 = scmp.lt.s32.totalorder %s604_s15, %s604_s15 }
  0x1c   :  { %p611_p13 = por %p610_p12, %p609_p11 }
  0x1e   :  { %p612_p0 = pnand %p611_p13, %p605_p10 }
  0x20   :  { %615 = shalt.err (!%p612_p0)
}
  0x21   :  { %50 = dma.hbm_to_vmem [thread:$0]  %s774_s3, 4096, %s45_s11, [#allocation6], %s643_s27, %s643_s27, %s644_s28  }
  0x22   :  { %636 = dma.done.wait [#allocation3], 128  }
  0x23   :  { %637 = vsyncadd [#allocation3], 4294967168 }
  0x24   :  { %638 = dma.done.wait [#allocation6], 6144  }
  0x25   :  { %639 = vsyncadd [#allocation6], 4294961152  ;;  %v647_v0 = vmov 0.0   ;;  %vm648_vm0 = vmmov 0   ;;  %v82_v1 = vld [vmem:[#allocation5 + $0x78] sm:$0xff]  ;;  %v81_v2 = vld [vmem:[#allocation5 + $0x70] sm:$0xff] }
  0x26   :  { %443 = vmatprep.subr.mxu0 %v647_v0  ;;  %475 = vmatprep.mubr.msk.f32.mxu0 %vm648_vm0, %v647_v0  ;;  %v80_v3 = vld [vmem:[#allocation5 + $0x68] sm:$0xff]  ;;  %v79_v4 = vld [vmem:[#allocation5 + $0x60] sm:$0xff]  ;;  %v176_v5 = vld [vmem:[#allocation7 + $0x78] sm:$0xff]  ;;  %s649_s24 = smov [#allocation8]  }
  0x27   :  { %478 = vmatprep.subr.mxu1 %v647_v0  ;;  %510 = vmatprep.mubr.msk.f32.mxu1 %vm648_vm0, %v647_v0  ;;  %v78_v6 = vld [vmem:[#allocation5 + $0x58] sm:$0xff]  ;;  %v175_v7 = vld [vmem:[#allocation7 + $0x70] sm:$0xff]  ;;  %v174_v8 = vld [vmem:[#allocation7 + $0x68] sm:$0xff]  ;;  %s376_s25 = sshll.u32 %s649_s24, 4  ;;  %s377_s25 = int_to_ptr.vmem [resolvable:$true] %s376_s25 }
  0x28   :  { %444 = vmatpush3.msra.mxu0 %v82_v1  ;;  %479 = vmatpush3.msra.mxu1 %v176_v5  ;;  %v77_v9 = vld [vmem:[#allocation5 + $0x50] sm:$0xff]  ;;  %v173_v10 = vld [vmem:[#allocation7 + $0x60] sm:$0xff]  ;;  %v76_v11 = vld [vmem:[#allocation5 + $0x48] sm:$0xff]  ;;  %p621_p2 = scmp.lt.s32.totalorder %s377_s25, %s377_s25 }
  0x29   :  { %445 = vmatprep.subr.mxu0 %v647_v0  ;;  %480 = vmatprep.subr.mxu1 %v647_v0  ;;  %v172_v12 = vld [vmem:[#allocation7 + $0x58] sm:$0xff]  ;;  %v75_v13 = vld [vmem:[#allocation5 + $0x40] sm:$0xff]  ;;  %v171_v14 = vld [vmem:[#allocation7 + $0x50] sm:$0xff] }
  0x2a   :  { %446 = vmatpush3.msra.mxu0 %v81_v2  ;;  %481 = vmatpush3.msra.mxu1 %v175_v7  ;;  %v74_v15 = vld [vmem:[#allocation5 + $0x38] sm:$0xff]  ;;  %v170_v16 = vld [vmem:[#allocation7 + $0x48] sm:$0xff]  ;;  %v73_v17 = vld [vmem:[#allocation5 + $0x30] sm:$0xff] }
  0x2b   :  { %447 = vmatprep.subr.mxu0 %v647_v0  ;;  %482 = vmatprep.subr.mxu1 %v647_v0  ;;  %v169_v18 = vld [vmem:[#allocation7 + $0x40] sm:$0xff]  ;;  %v72_v19 = vld [vmem:[#allocation5 + $0x28] sm:$0xff]  ;;  %v168_v20 = vld [vmem:[#allocation7 + $0x38] sm:$0xff] }
  0x2c   :  { %448 = vmatpush3.msra.mxu0 %v80_v3  ;;  %483 = vmatpush3.msra.mxu1 %v174_v8  ;;  %v71_v21 = vld [vmem:[#allocation5 + $0x20] sm:$0xff]  ;;  %v167_v22 = vld [vmem:[#allocation7 + $0x30] sm:$0xff]  ;;  %v70_v23 = vld [vmem:[#allocation5 + $0x18] sm:$0xff] }
  0x2d   :  { %449 = vmatprep.subr.mxu0 %v647_v0  ;;  %484 = vmatprep.subr.mxu1 %v647_v0  ;;  %v166_v24 = vld [vmem:[#allocation7 + $0x28] sm:$0xff]  ;;  %v69_v25 = vld [vmem:[#allocation5 + $0x10] sm:$0xff]  ;;  %v165_v26 = vld [vmem:[#allocation7 + $0x20] sm:$0xff] }
  0x2e   :  { %450 = vmatpush3.msra.mxu0 %v79_v4  ;;  %485 = vmatpush3.msra.mxu1 %v173_v10  ;;  %v68_v27 = vld [vmem:[#allocation5 + $0x8] sm:$0xff]  ;;  %v164_v28 = vld [vmem:[#allocation7 + $0x18] sm:$0xff]  ;;  %v67_v29 = vld [vmem:[#allocation5] sm:$0xff] }
  0x2f   :  { %451 = vmatprep.subr.mxu0 %v647_v0  ;;  %486 = vmatprep.subr.mxu1 %v647_v0  ;;  %v66_v30 = vld [vmem:[#allocation2] sm:$0xff]  ;;  %v163_v31 = vld [vmem:[#allocation7 + $0x10] sm:$0xff]  ;;  %v162_v32 = vld [vmem:[#allocation7 + $0x8] sm:$0xff] }
  0x30   :  { %452 = vmatpush3.msra.mxu0 %v78_v6  ;;  %487 = vmatpush3.msra.mxu1 %v172_v12  ;;  %v161_v33 = vld [vmem:[#allocation7] sm:$0xff]  ;;  %v271_v34 = vld [vmem:[#allocation7 + $0xf8] sm:$0xff]  ;;  %v270_v35 = vld [vmem:[#allocation7 + $0xf0] sm:$0xff] }
  0x31   :  { %453 = vmatprep.subr.mxu0 %v647_v0  ;;  %488 = vmatprep.subr.mxu1 %v647_v0  ;;  %v269_v36 = vld [vmem:[#allocation7 + $0xe8] sm:$0xff]  ;;  %v268_v37 = vld [vmem:[#allocation7 + $0xe0] sm:$0xff]  ;;  %v267_v38 = vld [vmem:[#allocation7 + $0xd8] sm:$0xff] }
  0x32   :  { %454 = vmatpush3.msra.mxu0 %v77_v9  ;;  %489 = vmatpush3.msra.mxu1 %v171_v14  ;;  %v266_v39 = vld [vmem:[#allocation7 + $0xd0] sm:$0xff]  ;;  %v265_v40 = vld [vmem:[#allocation7 + $0xc8] sm:$0xff]  ;;  %v264_v41 = vld [vmem:[#allocation7 + $0xc0] sm:$0xff] }
  0x33   :  { %455 = vmatprep.subr.mxu0 %v647_v0  ;;  %490 = vmatprep.subr.mxu1 %v647_v0  ;;  %v263_v42 = vld [vmem:[#allocation7 + $0xb8] sm:$0xff]  ;;  %v262_v43 = vld [vmem:[#allocation7 + $0xb0] sm:$0xff]  ;;  %v261_v44 = vld [vmem:[#allocation7 + $0xa8] sm:$0xff] }
  0x34   :  { %456 = vmatpush3.msra.mxu0 %v76_v11  ;;  %491 = vmatpush3.msra.mxu1 %v170_v16  ;;  %v260_v45 = vld [vmem:[#allocation7 + $0xa0] sm:$0xff]  ;;  %v259_v46 = vld [vmem:[#allocation7 + $0x98] sm:$0xff]  ;;  %v258_v52 = vld [vmem:[#allocation7 + $0x90] sm:$0xff] }
  0x35   :  { %457 = vmatprep.subr.mxu0 %v647_v0  ;;  %492 = vmatprep.subr.mxu1 %v647_v0  ;;  %v386_v47 = vld [vmem:[%s773_s2] ss:$0 sm:$0xff]  ;;  %v257_v53 = vld [vmem:[#allocation7 + $0x88] sm:$0xff]  ;;  %v256_v54 = vld [vmem:[#allocation7 + $0x80] sm:$0xff] }
  0x36   :  { %458 = vmatpush3.msra.mxu0 %v75_v13  ;;  %493 = vmatpush3.msra.mxu1 %v169_v18  ;;  %v387_v55 = vld [vmem:[%s775_s4] ss:$0 sm:$0xff]  ;;  %v389_v60 = vld [vmem:[%s775_s4 + $0x1] ss:$0 sm:$0xff]  ;;  %s616_s4 = scalar_lea.vmem %s377_s25, 128 }
  0x37   :  { %459 = vmatprep.subr.mxu0 %v647_v0  ;;  %494 = vmatprep.subr.mxu1 %v647_v0  ;;  %v391_v3 = vld [vmem:[%s777_s6] ss:$0 sm:$0xff]  ;;  %p617_p1 = scmp.ne.s32.totalorder %s377_s25, %s616_s4  ;;  %p622_p3 = scmp.lt.s32.totalorder %s616_s4, %s616_s4 }
  0x38   :  { %460 = vmatpush3.msra.mxu0 %v74_v15  ;;  %495 = vmatpush3.msra.mxu1 %v168_v20 }
  0x39   :  { %461 = vmatprep.subr.mxu0 %v647_v0  ;;  %496 = vmatprep.subr.mxu1 %v647_v0  ;;  %p623_p4 = por %p622_p3, %p621_p2 }
  0x3a   :  { %462 = vmatpush3.msra.mxu0 %v73_v17  ;;  %497 = vmatpush3.msra.mxu1 %v167_v22 }
  0x3b   :  { %463 = vmatprep.subr.mxu0 %v647_v0  ;;  %498 = vmatprep.subr.mxu1 %v647_v0  ;;  %p624_p5 = pnand %p623_p4, %p617_p1 }
  0x3c   :  { %464 = vmatpush3.msra.mxu0 %v72_v19  ;;  %499 = vmatpush3.msra.mxu1 %v166_v24 }
  0x3d   :  { %465 = vmatprep.subr.mxu0 %v647_v0  ;;  %500 = vmatprep.subr.mxu1 %v647_v0 }
  0x3e   :  { %466 = vmatpush3.msra.mxu0 %v71_v21  ;;  %501 = vmatpush3.msra.mxu1 %v165_v26 }
  0x3f   :  { %467 = vmatprep.subr.mxu0 %v647_v0  ;;  %502 = vmatprep.subr.mxu1 %v647_v0 }
  0x40   :  { %468 = vmatpush3.msra.mxu0 %v70_v23  ;;  %503 = vmatpush3.msra.mxu1 %v164_v28 }
  0x41   :  { %469 = vmatprep.subr.mxu0 %v647_v0  ;;  %504 = vmatprep.subr.mxu1 %v647_v0 }
  0x42   :  { %470 = vmatpush3.msra.mxu0 %v69_v25  ;;  %505 = vmatpush3.msra.mxu1 %v163_v31 }
  0x43   :  { %471 = vmatprep.subr.mxu0 %v647_v0  ;;  %506 = vmatprep.subr.mxu1 %v647_v0 }
  0x44   :  { %472 = vmatpush3.msra.mxu0 %v68_v27  ;;  %507 = vmatpush3.msra.mxu1 %v162_v32 }
  0x45   :  { %473 = vmatprep.subr.mxu0 %v647_v0  ;;  %508 = vmatprep.subr.mxu1 %v647_v0 }
  0x46   :  { %474 = vmatpush3.msra.mxu0 %v67_v29  ;;  %509 = vmatpush3.msra.mxu1 %v161_v33 }
  0x47   :  { %476 = vmatmul.mubr.f32.vlgmr.msra.gmra.mxu0 %v66_v30  ;;  %513 = vmatprep.subr.mxu0 %v647_v0 }
  0x48   :  { %545 = vmatprep.mubr.msk.f32.mxu0 %vm648_vm0, %v647_v0  ;;  %514 = vmatpush3.msra.mxu0 %v271_v34 }
  0x49   :  { %515 = vmatprep.subr.mxu0 %v647_v0 }
  0x4a   :  { %516 = vmatpush3.msra.mxu0 %v270_v35 }
  0x4b   :  { %517 = vmatprep.subr.mxu0 %v647_v0 }
  0x4c   :  { %518 = vmatpush3.msra.mxu0 %v269_v36 }
  0x4d   :  { %519 = vmatprep.subr.mxu0 %v647_v0 }
  0x4e   :  { %520 = vmatpush3.msra.mxu0 %v268_v37 }
  0x4f   :  { %521 = vmatprep.subr.mxu0 %v647_v0 }
  0x50   :  { %522 = vmatpush3.msra.mxu0 %v267_v38 }
  0x51   :  { %523 = vmatprep.subr.mxu0 %v647_v0 }
  0x52   :  { %524 = vmatpush3.msra.mxu0 %v266_v39 }
  0x53   :  { %525 = vmatprep.subr.mxu0 %v647_v0 }
  0x54   :  { %526 = vmatpush3.msra.mxu0 %v265_v40 }
  0x55   :  { %527 = vmatprep.subr.mxu0 %v647_v0 }
  0x56   :  { %528 = vmatpush3.msra.mxu0 %v264_v41 }
  0x57   :  { %529 = vmatprep.subr.mxu0 %v647_v0 }
  0x58   :  { %530 = vmatpush3.msra.mxu0 %v263_v42 }
  0x59   :  { %531 = vmatprep.subr.mxu0 %v647_v0 }
  0x5a   :  { %532 = vmatpush3.msra.mxu0 %v262_v43 }
  0x5b   :  { %533 = vmatprep.subr.mxu0 %v647_v0 }
  0x5c   :  { %534 = vmatpush3.msra.mxu0 %v261_v44 }
  0x5d   :  { %535 = vmatprep.subr.mxu0 %v647_v0 }
  0x5e   :  { %536 = vmatpush3.msra.mxu0 %v260_v45 }
  0x5f   :  { %537 = vmatprep.subr.mxu0 %v647_v0 }
  0x60   :  { %538 = vmatpush3.msra.mxu0 %v259_v46 }
  0x61   :  { %539 = vmatprep.subr.mxu0 %v647_v0 }
  0x62   :  { %540 = vmatpush3.msra.mxu0 %v258_v52 }
  0x63   :  { %541 = vmatprep.subr.mxu0 %v647_v0 }
  0x64   :  { %542 = vmatpush3.msra.mxu0 %v257_v53 }
  0x65   :  { %543 = vmatprep.subr.mxu0 %v647_v0  ;;  %v390_v0 = vld [vmem:[%s776_s5] ss:$0 sm:$0xff] }
  0x66   :  { %544 = vmatpush3.msra.mxu0 %v256_v54 }
 0x107   :  { %v156_v48 = vpop.f32.mrf.mxu0 }
 0x108   :  { %v157_v49 = vadd.f32 %v386_v47, %v156_v48 }
 0x109   :  { %v477_v50 = vpop.f32.mrf.mxu0 }
 0x10a   :  { %v160_v51 = vmax.f32 %v157_v49, 0.0 }
 0x10c   :  { %511 = vmatmul.mubr.f32.vlgmr.msra.gmra.mxu1 %v160_v51 }
 0x1cc   :  { %v250_v56 = vpop.f32.mrf.mxu1 }
 0x1cd   :  { %v251_v57 = vadd.f32 %v387_v55, %v250_v56 }
 0x1ce   :  { %v512_v58 = vpop.f32.mrf.mxu1 }
 0x1cf   :  { %v254_v59 = vmax.f32 %v251_v57, 0.0 }
 0x1d1   :  { %546 = vmatmul.mubr.f32.vlgmr.msra.gmra.mxu0 %v254_v59 }
 0x291   :  { %v346_v61 = vpop.f32.mrf.mxu0 }
 0x292   :  { %v347_v62 = vadd.f32 %v389_v60, %v346_v61 }
 0x293   :  { %v547_v63 = vpop.f32.mrf.mxu0 }
 0x294   :  { %v350_v1 = vmax.f32 %v347_v62, 0.0 }
 0x296   :  { %v358_v2 = vmul.f32 %v390_v0, %v350_v1 }
 0x298   :  { %359 = vadd.xlane.f32.xlu0 %v358_v2 }
 0x321   :  { %v360_v4 = vpop.xlane.xlu0 %359 }
 0x322   :  { %v368_v5 = vadd.f32 %v391_v3, %v360_v4 }
 0x324   :  { %369 = vst [vmem:[#allocation8] sm:$0xff] %v368_v5 }
 0x325   :  { %627 = shalt.err (!%p624_p5)
}
 0x326   :  { %379 = dma.vmem_to_hbm [thread:$0]  %s377_s25, 128, %s778_s7, [#allocation4]  }
 0x327   :  { %640 = dma.done.wait [#allocation4], 128  }
 0x328   :  { %641 = vsyncadd [#allocation4], 4294967168 }
 0x329   :  { %383 = vsyncpa [#allocation3], 1 }
 0x32a   :  { %384 = vsyncpa [#allocation6], 1 }
 0x32b   :  { %385 = vsyncpa [#allocation4], 1 }

// kernel: tpu_custom_call.1
= control target key start
LH: loop header
LB: loop body
LE: loop exit
PB: predicated region body
PF: predicated region fallthrough
CT: control target
= control target key end

     0   :  { %12 = vsyncpa [#allocation3], 0  ;;  %s771_s0 = inlined_call_operand.hbm [shape: f32[8,128], index: 0, kind: input, shape index: {}]   ;;  %s772_s1 = inlined_call_operand.hbm [shape: f32[128,128], index: 1, kind: input, shape index: {}]   ;;  %s773_s2 = inlined_call_operand.vmem [shape: f32[1,128], index: 2, kind: input, shape index: {}]   ;;  %s774_s3 = inlined_call_operand.hbm [shape: f32[2,128,128], index: 3, kind: input, shape index: {}]   ;;  %s775_s4 = inlined_call_operand.vmem [shape: f32[2,1,128], index: 4, kind: input, shape index: {}]   ;;  %s776_s5 = inlined_call_operand.vmem [shape: f32[1,128], index: 5, kind: input, shape index: {}]   ;;  %s777_s6 = inlined_call_operand.vmem [shape: f32[1,128], index: 6, kind: input, shape index: {}]   ;;  %s778_s7 = inlined_call_operand.hbm [shape: f32[8,128], index: 7, kind: output, shape index: {}]  }
   0x1   :  { %13 = vsyncpa [#allocation6], 0 }
   0x2   :  { %14 = vsyncpa [#allocation4], 0  ;;  %s642_s24 = smov [#allocation5]  }
   0x3   :  { %s30_s25 = sshll.u32 %s642_s24, 4  ;;  %s31_s25 = int_to_ptr.vmem [resolvable:$true] %s30_s25 }
   0x4   :  { %s564_s26 = scalar_lea.vmem %s31_s25, 2048  ;;  %p569_p1 = scmp.lt.s32.totalorder %s31_s25, %s31_s25 }
   0x5   :  { %p565_p0 = scmp.ne.s32.totalorder %s31_s25, %s564_s26  ;;  %p570_p2 = scmp.lt.s32.totalorder %s564_s26, %s564_s26 }
   0x7   :  { %p571_p3 = por %p570_p2, %p569_p1 }
   0x9   :  { %p572_p4 = pnand %p571_p3, %p565_p0 }
   0xb   :  { %575 = shalt.err (!%p572_p4)
}
   0xc   :  { %s643_s27 = smov 128   ;;  %s644_s28 = smov 8  }
   0xd   :  { %36 = dma.hbm_to_vmem [thread:$0]  %s772_s1, 2048, %s31_s25, [#allocation6], %s643_s27, %s643_s27, %s644_s28  }
   0xe   :  { %s645_s8 = smov [#allocation2]   ;;  %s646_s10 = smov [#allocation7]  }
   0xf   :  { %s21_s9 = sshll.u32 %s645_s8, 4  ;;  %s44_s11 = sshll.u32 %s646_s10, 4  ;;  %s22_s9 = int_to_ptr.vmem [resolvable:$true] %s21_s9  ;;  %s45_s11 = int_to_ptr.vmem [resolvable:$true] %s44_s11 }
  0x10   :  { %s584_s12 = scalar_lea.vmem %s22_s9, 128  ;;  %p589_p6 = scmp.lt.s32.totalorder %s22_s9, %s22_s9 }
  0x11   :  { %p585_p5 = scmp.ne.s32.totalorder %s22_s9, %s584_s12  ;;  %p590_p7 = scmp.lt.s32.totalorder %s584_s12, %s584_s12 }
  0x13   :  { %p591_p8 = por %p590_p7, %p589_p6 }
  0x15   :  { %p592_p9 = pnand %p591_p8, %p585_p5 }
  0x17   :  { %595 = shalt.err (!%p592_p9)
}
  0x18   :  { %24 = dma.hbm_to_vmem [thread:$0]  %s771_s0, 128, %s22_s9, [#allocation3]  }
  0x19   :  { %s604_s15 = scalar_lea.vmem %s45_s11, 4096  ;;  %p609_p11 = scmp.lt.s32.totalorder %s45_s11, %s45_s11 }
  0x1a   :  { %p605_p10 = scmp.ne.s32.totalorder %s45_s11, %s604_s15  ;;  %p610_p12 = scmp.lt.s32.totalorder %s604_s15, %s604_s15 }
  0x1c   :  { %p611_p13 = por %p610_p12, %p609_p11 }
  0x1e   :  { %p612_p0 = pnand %p611_p13, %p605_p10 }
  0x20   :  { %615 = shalt.err (!%p612_p0)
}
  0x21   :  { %50 = dma.hbm_to_vmem [thread:$0]  %s774_s3, 4096, %s45_s11, [#allocation6], %s643_s27, %s643_s27, %s644_s28  }
  0x22   :  { %636 = dma.done.wait [#allocation3], 128  }
  0x23   :  { %637 = vsyncadd [#allocation3], 4294967168 }
  0x24   :  { %638 = dma.done.wait [#allocation6], 6144  }
  0x25   :  { %639 = vsyncadd [#allocation6], 4294961152  ;;  %v647_v0 = vmov 0.0   ;;  %vm648_vm0 = vmmov 0   ;;  %v82_v1 = vld [vmem:[#allocation5 + $0x78] sm:$0xff]  ;;  %v81_v2 = vld [vmem:[#allocation5 + $0x70] sm:$0xff] }
  0x26   :  { %443 = vmatprep.subr.mxu0 %v647_v0  ;;  %475 = vmatprep.mubr.msk.f32.mxu0 %vm648_vm0, %v647_v0  ;;  %v80_v3 = vld [vmem:[#allocation5 + $0x68] sm:$0xff]  ;;  %v79_v4 = vld [vmem:[#allocation5 + $0x60] sm:$0xff]  ;;  %v176_v5 = vld [vmem:[#allocation7 + $0x78] sm:$0xff]  ;;  %s649_s24 = smov [#allocation8]  }
  0x27   :  { %478 = vmatprep.subr.mxu1 %v647_v0  ;;  %510 = vmatprep.mubr.msk.f32.mxu1 %vm648_vm0, %v647_v0  ;;  %v78_v6 = vld [vmem:[#allocation5 + $0x58] sm:$0xff]  ;;  %v175_v7 = vld [vmem:[#allocation7 + $0x70] sm:$0xff]  ;;  %v174_v8 = vld [vmem:[#allocation7 + $0x68] sm:$0xff]  ;;  %s376_s25 = sshll.u32 %s649_s24, 4  ;;  %s377_s25 = int_to_ptr.vmem [resolvable:$true] %s376_s25 }
  0x28   :  { %444 = vmatpush3.msra.mxu0 %v82_v1  ;;  %479 = vmatpush3.msra.mxu1 %v176_v5  ;;  %v77_v9 = vld [vmem:[#allocation5 + $0x50] sm:$0xff]  ;;  %v173_v10 = vld [vmem:[#allocation7 + $0x60] sm:$0xff]  ;;  %v76_v11 = vld [vmem:[#allocation5 + $0x48] sm:$0xff]  ;;  %p621_p2 = scmp.lt.s32.totalorder %s377_s25, %s377_s25 }
  0x29   :  { %445 = vmatprep.subr.mxu0 %v647_v0  ;;  %480 = vmatprep.subr.mxu1 %v647_v0  ;;  %v172_v12 = vld [vmem:[#allocation7 + $0x58] sm:$0xff]  ;;  %v75_v13 = vld [vmem:[#allocation5 + $0x40] sm:$0xff]  ;;  %v171_v14 = vld [vmem:[#allocation7 + $0x50] sm:$0xff] }
  0x2a   :  { %446 = vmatpush3.msra.mxu0 %v81_v2  ;;  %481 = vmatpush3.msra.mxu1 %v175_v7  ;;  %v74_v15 = vld [vmem:[#allocation5 + $0x38] sm:$0xff]  ;;  %v170_v16 = vld [vmem:[#allocation7 + $0x48] sm:$0xff]  ;;  %v73_v17 = vld [vmem:[#allocation5 + $0x30] sm:$0xff] }
  0x2b   :  { %447 = vmatprep.subr.mxu0 %v647_v0  ;;  %482 = vmatprep.subr.mxu1 %v647_v0  ;;  %v169_v18 = vld [vmem:[#allocation7 + $0x40] sm:$0xff]  ;;  %v72_v19 = vld [vmem:[#allocation5 + $0x28] sm:$0xff]  ;;  %v168_v20 = vld [vmem:[#allocation7 + $0x38] sm:$0xff] }
  0x2c   :  { %448 = vmatpush3.msra.mxu0 %v80_v3  ;;  %483 = vmatpush3.msra.mxu1 %v174_v8  ;;  %v71_v21 = vld [vmem:[#allocation5 + $0x20] sm:$0xff]  ;;  %v167_v22 = vld [vmem:[#allocation7 + $0x30] sm:$0xff]  ;;  %v70_v23 = vld [vmem:[#allocation5 + $0x18] sm:$0xff] }
  0x2d   :  { %449 = vmatprep.subr.mxu0 %v647_v0  ;;  %484 = vmatprep.subr.mxu1 %v647_v0  ;;  %v166_v24 = vld [vmem:[#allocation7 + $0x28] sm:$0xff]  ;;  %v69_v25 = vld [vmem:[#allocation5 + $0x10] sm:$0xff]  ;;  %v165_v26 = vld [vmem:[#allocation7 + $0x20] sm:$0xff] }
  0x2e   :  { %450 = vmatpush3.msra.mxu0 %v79_v4  ;;  %485 = vmatpush3.msra.mxu1 %v173_v10  ;;  %v68_v27 = vld [vmem:[#allocation5 + $0x8] sm:$0xff]  ;;  %v164_v28 = vld [vmem:[#allocation7 + $0x18] sm:$0xff]  ;;  %v67_v29 = vld [vmem:[#allocation5] sm:$0xff] }
  0x2f   :  { %451 = vmatprep.subr.mxu0 %v647_v0  ;;  %486 = vmatprep.subr.mxu1 %v647_v0  ;;  %v66_v30 = vld [vmem:[#allocation2] sm:$0xff]  ;;  %v163_v31 = vld [vmem:[#allocation7 + $0x10] sm:$0xff]  ;;  %v162_v32 = vld [vmem:[#allocation7 + $0x8] sm:$0xff] }
  0x30   :  { %452 = vmatpush3.msra.mxu0 %v78_v6  ;;  %487 = vmatpush3.msra.mxu1 %v172_v12  ;;  %v161_v33 = vld [vmem:[#allocation7] sm:$0xff]  ;;  %v271_v34 = vld [vmem:[#allocation7 + $0xf8] sm:$0xff]  ;;  %v270_v35 = vld [vmem:[#allocation7 + $0xf0] sm:$0xff] }
  0x31   :  { %453 = vmatprep.subr.mxu0 %v647_v0  ;;  %488 = vmatprep.subr.mxu1 %v647_v0  ;;  %v269_v36 = vld [vmem:[#allocation7 + $0xe8] sm:$0xff]  ;;  %v268_v37 = vld [vmem:[#allocation7 + $0xe0] sm:$0xff]  ;;  %v267_v38 = vld [vmem:[#allocation7 + $0xd8] sm:$0xff] }
  0x32   :  { %454 = vmatpush3.msra.mxu0 %v77_v9  ;;  %489 = vmatpush3.msra.mxu1 %v171_v14  ;;  %v266_v39 = vld [vmem:[#allocation7 + $0xd0] sm:$0xff]  ;;  %v265_v40 = vld [vmem:[#allocation7 + $0xc8] sm:$0xff]  ;;  %v264_v41 = vld [vmem:[#allocation7 + $0xc0] sm:$0xff] }
  0x33   :  { %455 = vmatprep.subr.mxu0 %v647_v0  ;;  %490 = vmatprep.subr.mxu1 %v647_v0  ;;  %v263_v42 = vld [vmem:[#allocation7 + $0xb8] sm:$0xff]  ;;  %v262_v43 = vld [vmem:[#allocation7 + $0xb0] sm:$0xff]  ;;  %v261_v44 = vld [vmem:[#allocation7 + $0xa8] sm:$0xff] }
  0x34   :  { %456 = vmatpush3.msra.mxu0 %v76_v11  ;;  %491 = vmatpush3.msra.mxu1 %v170_v16  ;;  %v260_v45 = vld [vmem:[#allocation7 + $0xa0] sm:$0xff]  ;;  %v259_v46 = vld [vmem:[#allocation7 + $0x98] sm:$0xff]  ;;  %v258_v52 = vld [vmem:[#allocation7 + $0x90] sm:$0xff] }
  0x35   :  { %457 = vmatprep.subr.mxu0 %v647_v0  ;;  %492 = vmatprep.subr.mxu1 %v647_v0  ;;  %v386_v47 = vld [vmem:[%s773_s2] ss:$0 sm:$0xff]  ;;  %v257_v53 = vld [vmem:[#allocation7 + $0x88] sm:$0xff]  ;;  %v256_v54 = vld [vmem:[#allocation7 + $0x80] sm:$0xff] }
  0x36   :  { %458 = vmatpush3.msra.mxu0 %v75_v13  ;;  %493 = vmatpush3.msra.mxu1 %v169_v18  ;;  %v387_v55 = vld [vmem:[%s775_s4] ss:$0 sm:$0xff]  ;;  %v389_v60 = vld [vmem:[%s775_s4 + $0x1] ss:$0 sm:$0xff]  ;;  %s616_s4 = scalar_lea.vmem %s377_s25, 128 }
  0x37   :  { %459 = vmatprep.subr.mxu0 %v647_v0  ;;  %494 = vmatprep.subr.mxu1 %v647_v0  ;;  %v391_v3 = vld [vmem:[%s777_s6] ss:$0 sm:$0xff]  ;;  %p617_p1 = scmp.ne.s32.totalorder %s377_s25, %s616_s4  ;;  %p622_p3 = scmp.lt.s32.totalorder %s616_s4, %s616_s4 }
  0x38   :  { %460 = vmatpush3.msra.mxu0 %v74_v15  ;;  %495 = vmatpush3.msra.mxu1 %v168_v20 }
  0x39   :  { %461 = vmatprep.subr.mxu0 %v647_v0  ;;  %496 = vmatprep.subr.mxu1 %v647_v0  ;;  %p623_p4 = por %p622_p3, %p621_p2 }
  0x3a   :  { %462 = vmatpush3.msra.mxu0 %v73_v17  ;;  %497 = vmatpush3.msra.mxu1 %v167_v22 }
  0x3b   :  { %463 = vmatprep.subr.mxu0 %v647_v0  ;;  %498 = vmatprep.subr.mxu1 %v647_v0  ;;  %p624_p5 = pnand %p623_p4, %p617_p1 }
  0x3c   :  { %464 = vmatpush3.msra.mxu0 %v72_v19  ;;  %499 = vmatpush3.msra.mxu1 %v166_v24 }
  0x3d   :  { %465 = vmatprep.subr.mxu0 %v647_v0  ;;  %500 = vmatprep.subr.mxu1 %v647_v0 }
  0x3e   :  { %466 = vmatpush3.msra.mxu0 %v71_v21  ;;  %501 = vmatpush3.msra.mxu1 %v165_v26 }
  0x3f   :  { %467 = vmatprep.subr.mxu0 %v647_v0  ;;  %502 = vmatprep.subr.mxu1 %v647_v0 }
  0x40   :  { %468 = vmatpush3.msra.mxu0 %v70_v23  ;;  %503 = vmatpush3.msra.mxu1 %v164_v28 }
  0x41   :  { %469 = vmatprep.subr.mxu0 %v647_v0  ;;  %504 = vmatprep.subr.mxu1 %v647_v0 }
  0x42   :  { %470 = vmatpush3.msra.mxu0 %v69_v25  ;;  %505 = vmatpush3.msra.mxu1 %v163_v31 }
  0x43   :  { %471 = vmatprep.subr.mxu0 %v647_v0  ;;  %506 = vmatprep.subr.mxu1 %v647_v0 }
  0x44   :  { %472 = vmatpush3.msra.mxu0 %v68_v27  ;;  %507 = vmatpush3.msra.mxu1 %v162_v32 }
  0x45   :  { %473 = vmatprep.subr.mxu0 %v647_v0  ;;  %508 = vmatprep.subr.mxu1 %v647_v0 }
  0x46   :  { %474 = vmatpush3.msra.mxu0 %v67_v29  ;;  %509 = vmatpush3.msra.mxu1 %v161_v33 }
  0x47   :  { %476 = vmatmul.mubr.f32.vlgmr.msra.gmra.mxu0 %v66_v30  ;;  %513 = vmatprep.subr.mxu0 %v647_v0 }
  0x48   :  { %545 = vmatprep.mubr.msk.f32.mxu0 %vm648_vm0, %v647_v0  ;;  %514 = vmatpush3.msra.mxu0 %v271_v34 }
  0x49   :  { %515 = vmatprep.subr.mxu0 %v647_v0 }
  0x4a   :  { %516 = vmatpush3.msra.mxu0 %v270_v35 }
  0x4b   :  { %517 = vmatprep.subr.mxu0 %v647_v0 }
  0x4c   :  { %518 = vmatpush3.msra.mxu0 %v269_v36 }
  0x4d   :  { %519 = vmatprep.subr.mxu0 %v647_v0 }
  0x4e   :  { %520 = vmatpush3.msra.mxu0 %v268_v37 }
  0x4f   :  { %521 = vmatprep.subr.mxu0 %v647_v0 }
  0x50   :  { %522 = vmatpush3.msra.mxu0 %v267_v38 }
  0x51   :  { %523 = vmatprep.subr.mxu0 %v647_v0 }
  0x52   :  { %524 = vmatpush3.msra.mxu0 %v266_v39 }
  0x53   :  { %525 = vmatprep.subr.mxu0 %v647_v0 }
  0x54   :  { %526 = vmatpush3.msra.mxu0 %v265_v40 }
  0x55   :  { %527 = vmatprep.subr.mxu0 %v647_v0 }
  0x56   :  { %528 = vmatpush3.msra.mxu0 %v264_v41 }
  0x57   :  { %529 = vmatprep.subr.mxu0 %v647_v0 }
  0x58   :  { %530 = vmatpush3.msra.mxu0 %v263_v42 }
  0x59   :  { %531 = vmatprep.subr.mxu0 %v647_v0 }
  0x5a   :  { %532 = vmatpush3.msra.mxu0 %v262_v43 }
  0x5b   :  { %533 = vmatprep.subr.mxu0 %v647_v0 }
  0x5c   :  { %534 = vmatpush3.msra.mxu0 %v261_v44 }
  0x5d   :  { %535 = vmatprep.subr.mxu0 %v647_v0 }
  0x5e   :  { %536 = vmatpush3.msra.mxu0 %v260_v45 }
  0x5f   :  { %537 = vmatprep.subr.mxu0 %v647_v0 }
  0x60   :  { %538 = vmatpush3.msra.mxu0 %v259_v46 }
  0x61   :  { %539 = vmatprep.subr.mxu0 %v647_v0 }
  0x62   :  { %540 = vmatpush3.msra.mxu0 %v258_v52 }
  0x63   :  { %541 = vmatprep.subr.mxu0 %v647_v0 }
  0x64   :  { %542 = vmatpush3.msra.mxu0 %v257_v53 }
  0x65   :  { %543 = vmatprep.subr.mxu0 %v647_v0  ;;  %v390_v0 = vld [vmem:[%s776_s5] ss:$0 sm:$0xff] }
  0x66   :  { %544 = vmatpush3.msra.mxu0 %v256_v54 }
 0x107   :  { %v156_v48 = vpop.f32.mrf.mxu0 }
 0x108   :  { %v157_v49 = vadd.f32 %v386_v47, %v156_v48 }
 0x109   :  { %v477_v50 = vpop.f32.mrf.mxu0 }
 0x10a   :  { %v160_v51 = vmax.f32 %v157_v49, 0.0 }
 0x10c   :  { %511 = vmatmul.mubr.f32.vlgmr.msra.gmra.mxu1 %v160_v51 }
 0x1cc   :  { %v250_v56 = vpop.f32.mrf.mxu1 }
 0x1cd   :  { %v251_v57 = vadd.f32 %v387_v55, %v250_v56 }
 0x1ce   :  { %v512_v58 = vpop.f32.mrf.mxu1 }
 0x1cf   :  { %v254_v59 = vmax.f32 %v251_v57, 0.0 }
 0x1d1   :  { %546 = vmatmul.mubr.f32.vlgmr.msra.gmra.mxu0 %v254_v59 }
 0x291   :  { %v346_v61 = vpop.f32.mrf.mxu0 }
 0x292   :  { %v347_v62 = vadd.f32 %v389_v60, %v346_v61 }
 0x293   :  { %v547_v63 = vpop.f32.mrf.mxu0 }
 0x294   :  { %v350_v1 = vmax.f32 %v347_v62, 0.0 }
 0x296   :  { %v358_v2 = vmul.f32 %v390_v0, %v350_v1 }
 0x298   :  { %359 = vadd.xlane.f32.xlu0 %v358_v2 }
 0x321   :  { %v360_v4 = vpop.xlane.xlu0 %359 }
 0x322   :  { %v368_v5 = vadd.f32 %v391_v3, %v360_v4 }
 0x324   :  { %369 = vst [vmem:[#allocation8] sm:$0xff] %v368_v5 }
 0x325   :  { %627 = shalt.err (!%p624_p5)
}
 0x326   :  { %379 = dma.vmem_to_hbm [thread:$0]  %s377_s25, 128, %s778_s7, [#allocation4]  }
 0x327   :  { %640 = dma.done.wait [#allocation4], 128  }
 0x328   :  { %641 = vsyncadd [#allocation4], 4294967168 }
 0x329   :  { %383 = vsyncpa [#allocation3], 1 }
 0x32a   :  { %384 = vsyncpa [#allocation6], 1 }
 0x32b   :  { %385 = vsyncpa [#allocation4], 1 }

</bundles_post_ra>
